<compile_context>
chip_gen: v5e
topology: v5e:2x2
jax: 0.10.0
libtpu: 0.0.40
codegen_flags: <defaults>
</compile_context>

<pallas_src>
import jax
import jax.numpy as jnp
from jax.experimental import pallas as pl
from jax.experimental.pallas import tpu as pltpu


def _anime_loss_kernel(pred_ref, targ_ref, out_ref):
    """One block of P planes -> single (1, 1, 1) f32 partial sum."""
    p = pred_ref[...].astype(jnp.float32)   # (P, H, W)
    t = targ_ref[...].astype(jnp.float32)   # (P, H, W)

    # Sobel (replicate pad + conv) is linear, so one stencil on d = p - t.
    d = p - t

    # ---- SmoothL1 (beta = 1.0), elementwise ----
    ad = jnp.abs(d)
    sl1 = jnp.where(ad < 1.0, 0.5 * d * d, ad - 0.5)

    # ---- replicate-neighbor shifts (edge-clamped) ----
    # TODO(synk): perf review suggests pltpu.roll + iota edge-fix (idle XLU slot);
    # kept as static slice+concat because roll lowering is not guaranteed for
    # lane/sublane dims that are not multiples of 128/8 (W = 16 here).
    def up(x):       # x[i-1, :], top edge replicated
        return jnp.concatenate([x[:, :1, :], x[:, :-1, :]], axis=1)

    def down(x):     # x[i+1, :], bottom edge replicated
        return jnp.concatenate([x[:, 1:, :], x[:, -1:, :]], axis=1)

    def left(x):     # x[:, j-1], left edge replicated
        return jnp.concatenate([x[:, :, :1], x[:, :, :-1]], axis=2)

    def right(x):    # x[:, j+1], right edge replicated
        return jnp.concatenate([x[:, :, 1:], x[:, :, -1:]], axis=2)

    # ---- separable Sobel, unscaled (1/8 kernel norm and 1/2 weight folded) ----
    e = right(d) - left(d)                 # horizontal central difference
    f = down(d) - up(d)                    # vertical central difference
    gx = up(e) + 2.0 * e + down(e)         # 8 * Sobel_x(d)
    gy = left(f) + 2.0 * f + right(f)      # 8 * Sobel_y(d)

    # loss = 1000/N * sum(sl1) + 1000/(2N) * sum(|gx/8| + |gy/8|)
    #      = 1000/N * sum(sl1 + 0.0625 * (|gx| + |gy|))
    contrib = sl1 + 0.0625 * (jnp.abs(gx) + jnp.abs(gy))

    # Full reduce in-kernel: plane-axis adds (VPU) then lane/sublane reduce
    # (XLU); 4 bytes of HBM writeback per grid step.
    plane_sum = jnp.sum(contrib, axis=0)                                 # (H, W)
    out_ref[...] = jnp.sum(plane_sum, axis=(0, 1), keepdims=True).reshape(1, 1, 1)


def _vmem_budget_bytes():
    """Generation-aware VMEM sizing (v5e/v6e: 128 MiB phys, v7x: 64 MiB)."""
    try:
        phys = int(pltpu.get_tpu_info().vmem_capacity_bytes)
    except Exception:
        phys = 64 * 1024 * 1024          # conservative (v7x-safe) fallback
    vmem_limit = max(32 * 1024 * 1024, min(phys * 3 // 4, 96 * 1024 * 1024))
    block_budget = vmem_limit * 7 // 10  # headroom for pipeline buffers/temps
    return vmem_limit, block_budget


def _planes_per_block(num_planes, H, W, itemsize, budget_bytes):
    """Largest plane-block fitting the VMEM budget, guaranteeing >= 2 blocks."""
    # Per plane: 2 inputs x 2 pipeline buffers + ~16 live f32 temporaries
    # (d, sl1, e, f, shifted copies, gx, gy, contrib) -- conservative so the
    # concat-materialized copies are accounted for.
    per_plane = (2 * 2 * itemsize + 16 * 4) * H * W
    p = max(1, min(budget_bytes // per_plane, num_planes))
    # Keep >= 2 grid blocks so both v7x TensorCores get work under
    # dimension_semantics=("parallel",); negligible cost on single-TC v5e/v6e.
    if num_planes >= 2:
        p = min(p, (num_planes + 1) // 2)
    # TODO(synk): for planes so large that even P=1 exceeds the budget, tile H
    # with a 1-row halo instead of requiring the full plane resident in VMEM.
    return int(max(1, p))


def anime_loss(prediction, target):
    """AnimeLoss.forward (perceptual/LPIPS term = 0, see TODO above)."""
    B, C, H, W = prediction.shape
    num_planes = B * C
    n_elems = B * C * H * W

    p = prediction.reshape(num_planes, H, W)
    t = target.reshape(num_planes, H, W)

    vmem_limit, budget = _vmem_budget_bytes()
    P = _planes_per_block(num_planes, H, W, p.dtype.itemsize, budget)
    num_blocks = (num_planes + P - 1) // P
    padded_planes = num_blocks * P
    if padded_planes != num_planes:
        # Zero-padded planes have d = 0 everywhere -> contribute exactly 0.
        pad = ((0, padded_planes - num_planes), (0, 0), (0, 0))
        p = jnp.pad(p, pad)
        t = jnp.pad(t, pad)

    cost = pl.CostEstimate(
        flops=30 * n_elems,
        transcendentals=0,
        bytes_accessed=2 * n_elems * p.dtype.itemsize + num_blocks * 4,
    )

    partial = pl.pallas_call(
        _anime_loss_kernel,
        out_shape=jax.ShapeDtypeStruct((num_blocks, 1, 1), jnp.float32),
        grid_spec=pltpu.PrefetchScalarGridSpec(
            num_scalar_prefetch=0,
            grid=(num_blocks,),
            in_specs=[
                pl.BlockSpec((P, H, W), lambda i: (i, 0, 0)),
                pl.BlockSpec((P, H, W), lambda i: (i, 0, 0)),
            ],
            out_specs=pl.BlockSpec((1, 1, 1), lambda i: (i, 0, 0)),
        ),
        compiler_params=pltpu.CompilerParams(
            dimension_semantics=("parallel",),   # independent blocks -> megacore OK
            vmem_limit_bytes=int(vmem_limit),
        ),
        cost_estimate=cost,
    )(p, t)

    # Tiny final reduction over num_blocks partials + scaling (the Sobel 2N
    # denominator and 1/8 normalization are folded into the in-kernel 0.0625).
    loss = (1000.0 / n_elems) * jnp.sum(partial)
    perceptual_loss_value = 0.0  # TODO(synk): LPIPS perceptual term omitted.
    return loss + perceptual_loss_value


# ---------------- pure-JAX reference (sanity check) ----------------
def _reference_anime_loss(prediction, target):
    d = prediction - target
    ad = jnp.abs(d)
    base = jnp.mean(jnp.where(ad < 1.0, 0.5 * d * d, ad - 0.5))

    def spatial_gradient(x):
        B, C, H, W = x.shape
        xp = jnp.pad(x, ((0, 0), (0, 0), (1, 1), (1, 1)), mode="edge")

        def win(u, v):
            return xp[:, :, u:u + H, v:v + W]

        gx = (-win(0, 0) + win(0, 2) - 2 * win(1, 0) + 2 * win(1, 2)
              - win(2, 0) + win(2, 2)) / 8.0
        gy = (-win(0, 0) - 2 * win(0, 1) - win(0, 2)
              + win(2, 0) + 2 * win(2, 1) + win(2, 2)) / 8.0
        return jnp.stack([gx, gy], axis=2)

    sobel = jnp.mean(jnp.abs(spatial_gradient(prediction) - spatial_gradient(target)))
    return 1000.0 * base + 1000.0 * sobel


if __name__ == "__main__":
    key = jax.random.PRNGKey(0)
    k1, k2 = jax.random.split(key)
    B, C, H, W = 2, 4, 16, 16
    prediction = jax.random.uniform(k1, (B, C, H, W), dtype=jnp.float32)
    target = jax.random.uniform(k2, (B, C, H, W), dtype=jnp.float32)

    loss = jax.block_until_ready(anime_loss(prediction, target))
    ref = jax.block_until_ready(_reference_anime_loss(prediction, target))
    assert jnp.allclose(loss, ref, rtol=1e-3, atol=1e-2), (loss, ref)

    print("KERNEL_OK")
</pallas_src>

<mosaic_0001>
module attributes {stable_mosaic.version = 11 : i64} {
  func.func @_anime_loss_kernel(%arg0: i32, %arg1: memref<4x16x16xf32, #tpu.memory_space<vmem>>, %arg2: memref<4x16x16xf32, #tpu.memory_space<vmem>>, %arg3: memref<1x1x1xf32, #tpu.memory_space<vmem>>) attributes {dimension_semantics = [#tpu.dimension_semantics<parallel>], iteration_bounds = array<i64: 2>, scalar_prefetch = 0 : i64, scratch_operands = 0 : i64, tpu.core_type = #tpu.core_type<tc>, window_params = [{transform_indices = @transform_0, window_bounds = array<i64: 4, 16, 16>}, {transform_indices = @transform_1, window_bounds = array<i64: 4, 16, 16>}, {transform_indices = @transform_2, window_bounds = array<i64: 1, 1, 1>}]} {
    %c0 = arith.constant 0 : index
    %c0_0 = arith.constant 0 : index
    %c0_1 = arith.constant 0 : index
    %0 = vector.load %arg1[%c0, %c0_0, %c0_1] : memref<4x16x16xf32, #tpu.memory_space<vmem>>, vector<4x16x16xf32>
    %c0_2 = arith.constant 0 : index
    %c0_3 = arith.constant 0 : index
    %c0_4 = arith.constant 0 : index
    %1 = vector.load %arg2[%c0_2, %c0_3, %c0_4] : memref<4x16x16xf32, #tpu.memory_space<vmem>>, vector<4x16x16xf32>
    %2 = arith.subf %0, %1 : vector<4x16x16xf32>
    %3 = math.absf %2 : vector<4x16x16xf32>
    %cst = arith.constant 1.000000e+00 : f32
    %4 = vector.broadcast %cst : f32 to vector<4x16x16xf32>
    %5 = arith.cmpf olt, %3, %4 : vector<4x16x16xf32>
    %cst_5 = arith.constant 5.000000e-01 : f32
    %6 = vector.broadcast %cst_5 : f32 to vector<4x16x16xf32>
    %7 = arith.mulf %6, %2 : vector<4x16x16xf32>
    %8 = arith.mulf %7, %2 : vector<4x16x16xf32>
    %cst_6 = arith.constant 5.000000e-01 : f32
    %9 = vector.broadcast %cst_6 : f32 to vector<4x16x16xf32>
    %10 = arith.subf %3, %9 : vector<4x16x16xf32>
    %11 = arith.select %5, %8, %10 : vector<4x16x16xi1>, vector<4x16x16xf32>
    %12 = vector.extract_strided_slice %2 {offsets = [0, 0, 1], sizes = [4, 16, 15], strides = [1, 1, 1]} : vector<4x16x16xf32> to vector<4x16x15xf32>
    %13 = vector.extract_strided_slice %2 {offsets = [0, 0, 15], sizes = [4, 16, 1], strides = [1, 1, 1]} : vector<4x16x16xf32> to vector<4x16x1xf32>
    %14 = tpu.concatenate %12, %13 in 2 : vector<4x16x15xf32>, vector<4x16x1xf32> -> vector<4x16x16xf32>
    %15 = vector.extract_strided_slice %2 {offsets = [0, 0, 0], sizes = [4, 16, 1], strides = [1, 1, 1]} : vector<4x16x16xf32> to vector<4x16x1xf32>
    %16 = vector.extract_strided_slice %2 {offsets = [0, 0, 0], sizes = [4, 16, 15], strides = [1, 1, 1]} : vector<4x16x16xf32> to vector<4x16x15xf32>
    %17 = tpu.concatenate %15, %16 in 2 : vector<4x16x1xf32>, vector<4x16x15xf32> -> vector<4x16x16xf32>
    %18 = arith.subf %14, %17 : vector<4x16x16xf32>
    %19 = vector.extract_strided_slice %2 {offsets = [0, 1, 0], sizes = [4, 15, 16], strides = [1, 1, 1]} : vector<4x16x16xf32> to vector<4x15x16xf32>
    %20 = vector.extract_strided_slice %2 {offsets = [0, 15, 0], sizes = [4, 1, 16], strides = [1, 1, 1]} : vector<4x16x16xf32> to vector<4x1x16xf32>
    %21 = tpu.concatenate %19, %20 in 1 : vector<4x15x16xf32>, vector<4x1x16xf32> -> vector<4x16x16xf32>
    %22 = vector.extract_strided_slice %2 {offsets = [0, 0, 0], sizes = [4, 1, 16], strides = [1, 1, 1]} : vector<4x16x16xf32> to vector<4x1x16xf32>
    %23 = vector.extract_strided_slice %2 {offsets = [0, 0, 0], sizes = [4, 15, 16], strides = [1, 1, 1]} : vector<4x16x16xf32> to vector<4x15x16xf32>
    %24 = tpu.concatenate %22, %23 in 1 : vector<4x1x16xf32>, vector<4x15x16xf32> -> vector<4x16x16xf32>
    %25 = arith.subf %21, %24 : vector<4x16x16xf32>
    %26 = vector.extract_strided_slice %18 {offsets = [0, 0, 0], sizes = [4, 1, 16], strides = [1, 1, 1]} : vector<4x16x16xf32> to vector<4x1x16xf32>
    %27 = vector.extract_strided_slice %18 {offsets = [0, 0, 0], sizes = [4, 15, 16], strides = [1, 1, 1]} : vector<4x16x16xf32> to vector<4x15x16xf32>
    %28 = tpu.concatenate %26, %27 in 1 : vector<4x1x16xf32>, vector<4x15x16xf32> -> vector<4x16x16xf32>
    %cst_7 = arith.constant 2.000000e+00 : f32
    %29 = vector.broadcast %cst_7 : f32 to vector<4x16x16xf32>
    %30 = arith.mulf %29, %18 : vector<4x16x16xf32>
    %31 = arith.addf %28, %30 : vector<4x16x16xf32>
    %32 = vector.extract_strided_slice %18 {offsets = [0, 1, 0], sizes = [4, 15, 16], strides = [1, 1, 1]} : vector<4x16x16xf32> to vector<4x15x16xf32>
    %33 = vector.extract_strided_slice %18 {offsets = [0, 15, 0], sizes = [4, 1, 16], strides = [1, 1, 1]} : vector<4x16x16xf32> to vector<4x1x16xf32>
    %34 = tpu.concatenate %32, %33 in 1 : vector<4x15x16xf32>, vector<4x1x16xf32> -> vector<4x16x16xf32>
    %35 = arith.addf %31, %34 : vector<4x16x16xf32>
    %36 = vector.extract_strided_slice %25 {offsets = [0, 0, 0], sizes = [4, 16, 1], strides = [1, 1, 1]} : vector<4x16x16xf32> to vector<4x16x1xf32>
    %37 = vector.extract_strided_slice %25 {offsets = [0, 0, 0], sizes = [4, 16, 15], strides = [1, 1, 1]} : vector<4x16x16xf32> to vector<4x16x15xf32>
    %38 = tpu.concatenate %36, %37 in 2 : vector<4x16x1xf32>, vector<4x16x15xf32> -> vector<4x16x16xf32>
    %cst_8 = arith.constant 2.000000e+00 : f32
    %39 = vector.broadcast %cst_8 : f32 to vector<4x16x16xf32>
    %40 = arith.mulf %39, %25 : vector<4x16x16xf32>
    %41 = arith.addf %38, %40 : vector<4x16x16xf32>
    %42 = vector.extract_strided_slice %25 {offsets = [0, 0, 1], sizes = [4, 16, 15], strides = [1, 1, 1]} : vector<4x16x16xf32> to vector<4x16x15xf32>
    %43 = vector.extract_strided_slice %25 {offsets = [0, 0, 15], sizes = [4, 16, 1], strides = [1, 1, 1]} : vector<4x16x16xf32> to vector<4x16x1xf32>
    %44 = tpu.concatenate %42, %43 in 2 : vector<4x16x15xf32>, vector<4x16x1xf32> -> vector<4x16x16xf32>
    %45 = arith.addf %41, %44 : vector<4x16x16xf32>
    %46 = math.absf %35 : vector<4x16x16xf32>
    %47 = math.absf %45 : vector<4x16x16xf32>
    %48 = arith.addf %46, %47 : vector<4x16x16xf32>
    %cst_9 = arith.constant 6.250000e-02 : f32
    %49 = vector.broadcast %cst_9 : f32 to vector<4x16x16xf32>
    %50 = arith.mulf %49, %48 : vector<4x16x16xf32>
    %51 = arith.addf %11, %50 : vector<4x16x16xf32>
    %cst_10 = arith.constant dense<0.000000e+00> : vector<16x16xf32>
    %52 = vector.multi_reduction <add>, %51, %cst_10 [0] : vector<4x16x16xf32> to vector<16x16xf32>
    %53 = vector.shape_cast %52 : vector<16x16xf32> to vector<1x16x16xf32>
    %cst_11 = arith.constant dense<0.000000e+00> : vector<1xf32>
    %54 = vector.multi_reduction <add>, %53, %cst_11 [1, 2] : vector<1x16x16xf32> to vector<1xf32>
    %55 = vector.shape_cast %54 : vector<1xf32> to vector<1x1x1xf32>
    %56 = vector.extract %55[0, 0, 0] : f32 from vector<1x1x1xf32>
    %57 = vector.broadcast %56 : f32 to vector<1x1xf32>
    %58 = vector.shape_cast %57 : vector<1x1xf32> to vector<1x1x1xf32>
    %c0_12 = arith.constant 0 : index
    %c0_13 = arith.constant 0 : index
    %c0_14 = arith.constant 0 : index
    %59 = vector.load %arg3[%c0_12, %c0_13, %c0_14] : memref<1x1x1xf32, #tpu.memory_space<vmem>>, vector<1x1x1xf32>
    tpu.vector_store %arg3[%c0_12, %c0_13, %c0_14], %58 {strides = array<i32>} : memref<1x1x1xf32, #tpu.memory_space<vmem>>, vector<1x1x1xf32>,
    return
  }
  func.func @transform_0(%arg0: i32) -> (i32, i32, i32) {
    %c0_i32 = arith.constant 0 : i32
    %c0_i32_0 = arith.constant 0 : i32
    %c0_i32_1 = arith.constant 0 : i32
    return %arg0, %c0_i32, %c0_i32_0 : i32, i32, i32
  }
  func.func @transform_1(%arg0: i32) -> (i32, i32, i32) {
    %c0_i32 = arith.constant 0 : i32
    %c0_i32_0 = arith.constant 0 : i32
    %c0_i32_1 = arith.constant 0 : i32
    return %arg0, %c0_i32, %c0_i32_0 : i32, i32, i32
  }
  func.func @transform_2(%arg0: i32) -> (i32, i32, i32) {
    %c0_i32 = arith.constant 0 : i32
    %c0_i32_0 = arith.constant 0 : i32
    %c0_i32_1 = arith.constant 0 : i32
    return %arg0, %c0_i32, %c0_i32_0 : i32, i32, i32
  }
}

</mosaic_0001>

<bundles_post_ra>
// kernel: tpu_custom_call.1
= control target key start
LH: loop header
LB: loop body
LE: loop exit
PB: predicated region body
PF: predicated region fallthrough
CT: control target
= control target key end

     0   :  { %7 = vsyncpa [#allocation3], 0  ;;  %s1488_s0 = inlined_call_operand.hbm [shape: f32[8,16,16], index: 0, kind: input, shape index: {}]   ;;  %s1489_s1 = inlined_call_operand.hbm [shape: f32[8,16,16], index: 1, kind: input, shape index: {}]   ;;  %s1490_s2 = inlined_call_operand.vmem [shape: f32[2,1,1], index: 2, kind: output, shape index: {}]  }
   0x1   :  { %9 = vsyncpa [#allocation3 + $0x1], 0 }
   0x2   :  { %10 = vsyncpa [#allocation5], 0 }
   0x3   :  { %12 = vsyncpa [#allocation5 + $0x1], 0  ;;  %s945_s9 = smov 0   ;;  %s947_s10 = smov 0  }
   0x4   :  { %s949_s11 = smov 0   ;;  %s951_s12 = smov 0  }
   0x5 LB: > { %s964_s13 = sadd.s32 4294967295, %s924_s12   ;;  %s967_s14 = sadd.s32 1, %s924_s12   ;;  %s924_s12 = sphi %s951_s12, %s1510_s12   ;;  %s920_s11 = sphi %s949_s11, %s1509_s11   ;;  %s916_s10 = sphi %s947_s10, %s1508_s10   ;;  %s912_s9 = sphi %s945_s9, %s1507_s9  }
   0x6   : > { %s22_s15 = ssub.s32 %s924_s12, %s967_s14  ;;  %s25_s16 = sadd.s32 1, %s920_s11 }
   0x7   : > { %p23_p0 = scmp.eq.s32.totalorder %s22_s15, 0  ;;  %p32_p1 = scmp.ne.s32.totalorder %s920_s11, %s916_s10 }
   0x8   : > { %p33_p2 = scmp.eq.s32.totalorder %s924_s12, 0  ;;  %p38_p3 = scmp.ne.s32.totalorder %s916_s10, %s912_s9 }
   0x9   : > { %s977_s17 = scalar_select %p23_p0, %s920_s11, %s25_s16  }
   0xa   : > { %p979_p4 = por %p33_p2, %p32_p1  ;;  %p39_p5 = scmp.eq.s32.totalorder %s964_s13, 0 }
   0xb   : > { %p789_p6 = scmp.lt.s32.totalorder %s924_s12, 2  ;;  %s990_s20 = sand.u32 1, %s920_s11  }
   0xc   : > { %p985_p7 = por %p39_p5, %p38_p3  ;;  %s751_s21 = sshll.u32 %s990_s20, 6 }
   0xd   : > { %s773_s22 = sshll.u32 %s924_s12, 6  ;;  %s118_s26 = scalar_lea.vmem [#allocation2], %s751_s21 }
   0xe   : > { %s124_s25 = scalar_lea.hbm %s1488_s0, %s773_s22  ;;  %s127_s27 = sshll.u32 %s118_s26, 4  ;;  %s128_s27 = int_to_ptr.vmem [resolvable:$true] %s127_s27 }
   0xf   : > { %s125_s28 = sshll.u32 %s124_s25, 4  ;;  %p1003_p8 = pnand %p789_p6, %p979_p4  ;;  %s126_s28 = int_to_ptr.hbm [resolvable:$true] %s125_s28 }
  0x10   : > { %p759_p9 = scmp.ge.s32.totalorder %s924_s12, 1  ;;  %s115_s30 = scalar_lea.sflag [#allocation3], %s990_s20 }
  0x11   : > { %s826_s3 = sshra.s32 %s126_s28, 4  ;;  %p830_p11 = pneg %p1003_p8  ;;  %s827_s3 = int_to_ptr.hbm [resolvable:$true] %s826_s3 }
  0x12   : > { %s828_s4 = scalar_lea.hbm %s827_s3, 64  ;;  %s833_s7 = scalar_lea.hbm %s1488_s0, 128 }
  0x13   : > { %p829_p10 = scmp.ne.s32.totalorder %s827_s3, %s828_s4  ;;  %p834_p0 = scmp.lt.s32.totalorder %s827_s3, %s1488_s0 }
  0x14   : > { %p835_p1 = scmp.lt.s32.totalorder %s833_s7, %s828_s4 }
  0x15   : > { %p831_p12 = pnand %p830_p11, %p829_p10 }
  0x16   : > { %p836_p2 = por %p835_p1, %p834_p0 }
  0x17   : > { %p832_p13 = pneg %p831_p12 }
  0x19   : > { %p837_p3 = pnand %p836_p2, %p832_p13 }
  0x1b   : > { %840 = shalt.err (!%p837_p3)
}
  0x1c   : > { %s926_s15 = smov 128   ;;  %s927_s16 = smov 8  }
  0x1d   : > { %785 = dma.hbm_to_vmem [thread:$0]  (!%p1003_p8), %s126_s28, 1024, %s128_s27, %s115_s30, %s926_s15, %s926_s15, %s927_s16  }
  0x1e   : > { %p158_p4 = scmp.lt.s32.totalorder %s924_s12, 3  ;;  %s147_s24 = scalar_lea.hbm %s1489_s1, %s773_s22 }
  0x1f   : > { %s148_s26 = sshll.u32 %s147_s24, 4  ;;  %s141_s3 = scalar_lea.vmem [#allocation4], %s751_s21  ;;  %s149_s26 = int_to_ptr.hbm [resolvable:$true] %s148_s26 }
  0x20   : > { %p1030_p5 = pnand %p759_p9, %p158_p4  ;;  %s150_s4 = sshll.u32 %s141_s3, 4  ;;  %s151_s4 = int_to_ptr.vmem [resolvable:$true] %s150_s4 }
  0x21   : > { %s138_s5 = scalar_lea.sflag [#allocation5], %s990_s20  ;;  %s856_s6 = sshra.s32 %s149_s26, 4  ;;  %s857_s6 = int_to_ptr.hbm [resolvable:$true] %s856_s6 }
  0x22   : > { %s858_s27 = scalar_lea.hbm %s857_s6, 64  ;;  %s863_s28 = scalar_lea.hbm %s1489_s1, 128 }
  0x23   : > { %p859_p6 = scmp.ne.s32.totalorder %s857_s6, %s858_s27  ;;  %p864_p9 = scmp.lt.s32.totalorder %s857_s6, %s1489_s1 }
  0x24   : > { %p865_p13 = scmp.lt.s32.totalorder %s863_s28, %s858_s27 }
  0x25   : > { %p861_p10 = pnand %p859_p6, %p830_p11 }
  0x26   : > { %p866_p0 = por %p865_p13, %p864_p9 }
  0x27   : > { %p862_p12 = pneg %p861_p10 }
  0x29   : > { %p867_p1 = pnand %p866_p0, %p862_p12 }
  0x2b   : > { %870 = shalt.err (!%p867_p1)
}
  0x2c   : > { %788 = dma.hbm_to_vmem [thread:$0]  (!%p1003_p8), %s149_s26, 1024, %s151_s4, %s138_s5, %s926_s15, %s926_s15, %s927_s16  }
  0x2d   : > { %162 = sbr.rel (%p1030_p5) target bundleno = 450 (0x1c2), region = 28  ;;  %s164_s20 = sand.u32 (!%p1030_p5), 1, %s916_s10  }
  0x2e   : > { %s760_s21 = sshll.u32 (!%p1030_p5), %s164_s20, 6  ;;  %s165_s8 = scalar_lea.sflag (!%p1030_p5), [#allocation3], %s164_s20 }
  0x2f   : > { %s1051_s9 = scalar_lea.vmem (!%p1030_p5), [#allocation2], %s760_s21 }
  0x32   : > { %903 = dma.done.wait (%p985_p7), %s165_s8, 1024  }
  0x33   : > { %905 = vsyncadd (%p985_p7), %s165_s8, 4294966272  ;;  %s175_s18 = scalar_lea.sflag [#allocation5], %s164_s20  ;;  %s1057_s23 = scalar_lea.vmem [#allocation4], %s760_s21 }
  0x34   : > { %907 = dma.done.wait (%p985_p7), %s175_s18, 1024  }
  0x35   : > { %909 = vsyncadd (%p985_p7), %s175_s18, 4294966272  ;;  %v210_v0 = vld [vmem:[%s1051_s9 + $0x10] sm:$0xff]  ;;  %v208_v2 = vld [vmem:[%s1051_s9] sm:$0xff]  ;;  %s928_s19 = smov 127   ;;  %s929_s29 = smov 1   ;;  %vm362_vm0 = vcmask 1046528  }
  0x36   : > { %v218_v1 = vld [vmem:[%s1057_s23 + $0x10] sm:$0xff]  ;;  %v216_v4 = vld [vmem:[%s1057_s23] sm:$0xff]  ;;  %v211_v6 = vld [vmem:[%s1051_s9 + $0x18] sm:$0xff]  ;;  %vm387_vm1 = vcmask 1040384   ;;  %vm345_vm2 = vcmask 7168   ;;  %vm312_vm3 = vcmask 121856  }
  0x37   : > { %v1066_v3 = vsub.f32 %v210_v0, %v218_v1  ;;  %v1069_v5 = vsub.f32 %v208_v2, %v216_v4  ;;  %v219_v7 = vld [vmem:[%s1057_s23 + $0x18] sm:$0xff]  ;;  %v209_v8 = vld [vmem:[%s1051_s9 + $0x8] sm:$0xff]  ;;  %v212_v12 = vld [vmem:[%s1051_s9 + $0x20] sm:$0xff]  ;;  %vm636_vm7 = vcmask 130048   ;;  %p205_p7 = scmp.lt.s32.totalorder %s964_s13, 1  ;;  %vm664_vm13 = vcmask 0  }
  0x38   : > { %v217_v9 = vld [vmem:[%s1057_s23 + $0x8] sm:$0xff]  ;;  %v1081_v10 = vsub.f32 %v211_v6, %v219_v7  ;;  %v220_v13 = vld [vmem:[%s1057_s23 + $0x20] sm:$0xff]  ;;  %v215_v18 = vld [vmem:[%s1051_s9 + $0x38] sm:$0xff] }
  0x39   : > { %292 = vrot.lane.b32.xlu1 %v1066_v3, %s928_s19  ;;  %321 = vrot.lane.b32.xlu2 %v1069_v5, %s929_s29  ;;  %v1083_v11 = vsub.f32 %v209_v8, %v217_v9  ;;  %v1093_v14 = vsub.f32 %v212_v12, %v220_v13  ;;  %v213_v15 = vld [vmem:[%s1051_s9 + $0x28] sm:$0xff]  ;;  %v223_v19 = vld [vmem:[%s1057_s23 + $0x38] sm:$0xff]  ;;  %v388_v25 = vrot.slane %v1069_v5, 7  ;;  %v363_v26 = vrot.slane %v1069_v5, 1  ;;  %s1512_s13 = smov (!%p205_p7, %s964_s13), 1 }
  0x3a   : > { %288 = vrot.lane.b32.xlu0 %v1069_v5, %s928_s19  ;;  %v221_v16 = vld [vmem:[%s1057_s23 + $0x28] sm:$0xff]  ;;  %v214_v20 = vld [vmem:[%s1051_s9 + $0x30] sm:$0xff]  ;;  %v1115_v22 = vsub.f32 %v215_v18, %v223_v19  ;;  %v367_v34 = vrot.slane %v1081_v10, 1  ;;  %v391_v35 = vrot.slane %v1066_v3, 7  ;;  %v392_v36 = vrot.slane %v1081_v10, 7  ;;  %s207_s24 = scalar_lea.vmem %s1490_s2, %s1512_s13 }
  0x3b   : > { %v1103_v17 = vsub.f32 %v213_v15, %v221_v16  ;;  %v222_v21 = vld [vmem:[%s1057_s23 + $0x30] sm:$0xff]  ;;  %v364_v24 = vrot.slane %v1083_v11, 1  ;;  %v389_v27 = vrot.slane %v1083_v11, 7  ;;  %v408_v29 = vsel %vm387_vm1, %v1069_v5, %v388_v25 }
  0x3c   : > { %v1117_v23 = vsub.f32 %v214_v20, %v222_v21  ;;  %v366_v37 = vrot.slane %v1066_v3, 1  ;;  %v369_v38 = vrot.slane %v1093_v14, 1  ;;  %v394_v40 = vrot.slane %v1093_v14, 7 }
  0x3d   : > { %v365_v28 = vsel %vm362_vm0, %v363_v26, %v364_v24  ;;  %v383_v30 = vsel %vm362_vm0, %v364_v24, %v1083_v11  ;;  %v390_v31 = vsel %vm387_vm1, %v388_v25, %v389_v27  ;;  %v370_v39 = vrot.slane %v1103_v17, 1 }
  0x3e   : > { %v1135_v32 = vsub.f32 %v365_v28, %v408_v29  ;;  %v1137_v33 = vsub.f32 %v383_v30, %v390_v31  ;;  %v384_v41 = vsel %vm362_vm0, %v367_v34, %v1081_v10  ;;  %v393_v42 = vsel %vm387_vm1, %v391_v35, %v392_v36 }
  0x3f   : > { %v368_v43 = vsel %vm362_vm0, %v366_v37, %v367_v34  ;;  %v409_v44 = vsel %vm387_vm1, %v1066_v3, %v391_v35  ;;  %v371_v45 = vsel %vm362_vm0, %v369_v38, %v370_v39  ;;  %v410_v46 = vsel %vm387_vm1, %v1093_v14, %v394_v40 }
  0x40   : > { %v1161_v47 = vsub.f32 %v384_v41, %v393_v42  ;;  %v1163_v48 = vsub.f32 %v368_v43, %v409_v44  ;;  %v1165_v49 = vsub.f32 %v371_v45, %v410_v46  ;;  %v395_v50 = vrot.slane %v1103_v17, 7 }
  0x41   : > { %294 = vrot.lane.b32.xlu1 %v1081_v10, %s928_s19  ;;  %323 = vrot.lane.b32.xlu2 %v1083_v11, %s929_s29  ;;  %v385_v51 = vsel %vm362_vm0, %v370_v39, %v1103_v17  ;;  %v372_v54 = vrot.slane %v1117_v23, 1  ;;  %v373_v55 = vrot.slane %v1115_v22, 1  ;;  %v397_v56 = vrot.slane %v1117_v23, 7 }
  0x42   : > { %290 = vrot.lane.b32.xlu0 %v1083_v11, %s928_s19  ;;  %v396_v52 = vsel %vm387_vm1, %v394_v40, %v395_v50  ;;  %v398_v60 = vrot.slane %v1115_v22, 7  ;;  %v233_v38 = vand.u32 2147483647, %v1083_v11  ;;  %v249_v39 = vmul.f32 0.5, %v1083_v11 }
  0x43   : > { %v1177_v53 = vsub.f32 %v385_v51, %v396_v52  ;;  %v374_v57 = vsel %vm362_vm0, %v372_v54, %v373_v55  ;;  %v411_v58 = vsel %vm387_vm1, %v1117_v23, %v397_v56  ;;  %v386_v61 = vsel %vm362_vm0, %v373_v55, %v1115_v22 }
  0x44   : > { %v1191_v59 = vsub.f32 %v374_v57, %v411_v58  ;;  %v399_v62 = vsel %vm387_vm1, %v397_v56, %v398_v60  ;;  %v541_v52 = vmul.f32 2.0, %v1137_v33  ;;  %v1252_v60 = vadd.f32 -0.5, %v233_v38 }
  0x45   : > { %v1203_v63 = vsub.f32 %v386_v61, %v399_v62  ;;  %vm1263_vm4 = vcmp.lt.f32.partialorder %v233_v38, 1.0 }
  0x49   : > { %327 = vrot.lane.b32.xlu1 %v1081_v10, %s929_s29  ;;  %296 = vrot.lane.b32.xlu2 %v1093_v14, %s928_s19 }
  0x4a   : > { %325 = vrot.lane.b32.xlu0 %v1066_v3, %s929_s29 }
  0x51   : > { %329 = vrot.lane.b32.xlu1 %v1093_v14, %s929_s29  ;;  %331 = vrot.lane.b32.xlu2 %v1103_v17, %s929_s29 }
  0x52   : > { %298 = vrot.lane.b32.xlu0 %v1103_v17, %s928_s19 }
  0x59   : > { %302 = vrot.lane.b32.xlu1 %v1115_v22, %s928_s19  ;;  %333 = vrot.lane.b32.xlu2 %v1117_v23, %s929_s29 }
  0x5a   : > { %300 = vrot.lane.b32.xlu0 %v1117_v23, %s928_s19 }
  0x61   : > { %508 = vrot.lane.b32.xlu1 %v1135_v32, %s929_s29  ;;  %510 = vrot.lane.b32.xlu2 %v1137_v33, %s929_s29 }
  0x62   : > { %335 = vrot.lane.b32.xlu0 %v1115_v22, %s929_s29 }
  0x69   : > { %514 = vrot.lane.b32.xlu1 %v1161_v47, %s929_s29  ;;  %516 = vrot.lane.b32.xlu2 %v1165_v49, %s929_s29 }
  0x6a   : > { %512 = vrot.lane.b32.xlu0 %v1163_v48, %s929_s29 }
  0x71   : > { %556 = vrot.lane.b32.xlu1 %v1135_v32, %s928_s19  ;;  %558 = vrot.lane.b32.xlu2 %v1137_v33, %s928_s19 }
  0x72   : > { %518 = vrot.lane.b32.xlu0 %v1177_v53, %s929_s29 }
  0x79   : > { %562 = vrot.lane.b32.xlu1 %v1161_v47, %s928_s19  ;;  %520 = vrot.lane.b32.xlu2 %v1191_v59, %s929_s29 }
  0x7a   : > { %560 = vrot.lane.b32.xlu0 %v1163_v48, %s928_s19 }
  0x81   : > { %564 = vrot.lane.b32.xlu1 %v1165_v49, %s928_s19  ;;  %566 = vrot.lane.b32.xlu2 %v1177_v53, %s928_s19 }
  0x82   : > { %522 = vrot.lane.b32.xlu0 %v1203_v63, %s929_s29 }
  0x89   : > { %570 = vrot.lane.b32.xlu1 %v1203_v63, %s928_s19 }
  0x8a   : > { %568 = vrot.lane.b32.xlu0 %v1191_v59, %s928_s19 }
  0x93   : > { %v322_v0 = vpop.permute.xlu2 %321 }
  0x94   : > { %v346_v24 = vsel %vm345_vm2, %v1069_v5, %v322_v0 }
  0x9b   : > { %v324_v1 = vpop.permute.xlu2 %323 }
  0x9c   : > { %v347_v20 = vsel %vm345_vm2, %v1083_v11, %v324_v1  ;;  %v1259_v1 = vmul.f32 %v249_v39, %v1083_v11 }
  0xa3   : > { %v297_v2 = vpop.permute.xlu2 %296 }
  0xa4   : > { %v317_v50 = vsel %vm312_vm3, %v297_v2, %v1093_v14 }
  0xab   : > { %v293_v4 = vpop.permute.xlu1 %292  ;;  %v332_v7 = vpop.permute.xlu2 %331 }
  0xac   : > { %v289_v6 = vpop.permute.xlu0 %288  ;;  %v315_v37 = vsel %vm312_vm3, %v293_v4, %v1066_v3  ;;  %v351_v56 = vsel %vm345_vm2, %v1103_v17, %v332_v7 }
  0xad   : > { %v313_v25 = vsel %vm312_vm3, %v289_v6, %v1069_v5  ;;  %v544_v6 = vmul.f32 2.0, %v1165_v49 }
  0xae   : > { %v354_v27 = vsub.f32 %v313_v25, %v346_v24 }
  0xb0   : > { %v428_v34 = vrot.slane %v354_v27, 7  ;;  %v452_v44 = vmul.f32 2.0, %v354_v27  ;;  %v468_v57 = vrot.slane %v354_v27, 1 }
  0xb2   : > { %v448_v55 = vsel %vm387_vm1, %v354_v27, %v428_v34 }
  0xb3   : > { %v295_v8 = vpop.permute.xlu1 %294  ;;  %v334_v12 = vpop.permute.xlu2 %333 }
  0xb4   : > { %v291_v9 = vpop.permute.xlu0 %290  ;;  %v316_v40 = vsel %vm312_vm3, %v295_v8, %v1081_v10  ;;  %v460_v8 = vadd.f32 %v452_v44, %v448_v55  ;;  %v1295_v44 = vmul.f32 2.0, %v1191_v59  ;;  %v1301_v55 = vmul.f32 2.0, %v1177_v53 }
  0xb5   : > { %v314_v21 = vsel %vm312_vm3, %v291_v9, %v1083_v11  ;;  %v352_v9 = vsel %vm345_vm2, %v1117_v23, %v334_v12  ;;  %v273_v12 = vsel %vm1263_vm4, %v1259_v1, %v1252_v60 }
  0xb6   : > { %v355_v26 = vsub.f32 %v314_v21, %v347_v20 }
  0xb8   : > { %v429_v30 = vrot.slane %v355_v26, 7  ;;  %v453_v41 = vmul.f32 2.0, %v355_v26  ;;  %v469_v51 = vrot.slane %v355_v26, 1 }
  0xba   : > { %v430_v46 = vsel %vm387_vm1, %v428_v34, %v429_v30  ;;  %v470_v11 = vsel %vm362_vm0, %v468_v57, %v469_v51  ;;  %v1284_v30 = vmul.f32 2.0, %v1163_v48 }
  0xbb   : > { %v328_v13 = vpop.permute.xlu1 %327  ;;  %v511_v19 = vpop.permute.xlu2 %510  ;;  %v461_v2 = vadd.f32 %v453_v41, %v430_v46 }
  0xbc   : > { %v326_v15 = vpop.permute.xlu0 %325  ;;  %v349_v35 = vsel %vm345_vm2, %v1081_v10, %v328_v13  ;;  %v488_v13 = vsel %vm362_vm0, %v469_v51, %v355_v26 }
  0xbd   : > { %v348_v31 = vsel %vm345_vm2, %v1066_v3, %v326_v15  ;;  %v1241_v45 = vsub.f32 %v316_v40, %v349_v35  ;;  %v540_v15 = vmul.f32 2.0, %v1135_v32  ;;  %v1280_v25 = vadd.f32 %v488_v13, %v461_v2 }
  0xbe   : > { %v356_v42 = vsub.f32 %v315_v37, %v348_v31  ;;  %v1289_v31 = vadd.f32 %v470_v11, %v460_v8 }
  0xbf   : > { %v432_v4 = vrot.slane %v1241_v45, 7  ;;  %v455_v24 = vmul.f32 2.0, %v1241_v45  ;;  %v472_v35 = vrot.slane %v1241_v45, 1  ;;  %v597_v51 = vand.u32 2147483647, %v1280_v25 }
  0xc0   : > { %v431_v62 = vrot.slane %v356_v42, 7  ;;  %v471_v37 = vrot.slane %v356_v42, 1 }
  0xc2   : > { %v449_v27 = vsel %vm387_vm1, %v356_v42, %v431_v62  ;;  %v433_v34 = vsel %vm387_vm1, %v431_v62, %v432_v4  ;;  %v473_v8 = vsel %vm362_vm0, %v471_v37, %v472_v35 }
  0xc3   : > { %v330_v16 = vpop.permute.xlu1 %329  ;;  %v1231_v36 = vpop.permute.xlu2 %516 }
  0xc4   : > { %v299_v18 = vpop.permute.xlu0 %298  ;;  %v350_v43 = vsel %vm345_vm2, %v1093_v14, %v330_v16  ;;  %v454_v16 = vmul.f32 2.0, %v356_v42  ;;  %v248_v42 = vmul.f32 0.5, %v1069_v5 }
  0xc5   : > { %v1250_v58 = vsub.f32 %v317_v50, %v350_v43  ;;  %v318_v0 = vsel %vm312_vm3, %v299_v18, %v1103_v17  ;;  %v533_v18 = vsel %vm345_vm2, %v1137_v33, %v511_v19  ;;  %v1287_v19 = vmul.f32 2.0, %v1161_v47 }
  0xc6   : > { %v359_v21 = vsub.f32 %v318_v0, %v351_v56  ;;  %v549_v38 = vadd.f32 %v541_v52, %v533_v18  ;;  %v462_v46 = vadd.f32 %v454_v16, %v449_v27  ;;  %v463_v52 = vadd.f32 %v455_v24, %v433_v34 }
  0xc7   : > { %v434_v20 = vrot.slane %v1250_v58, 7  ;;  %v456_v39 = vmul.f32 2.0, %v1250_v58  ;;  %v474_v56 = vrot.slane %v1250_v58, 1  ;;  %v232_v0 = vand.u32 2147483647, %v1069_v5 }
  0xc8   : > { %v435_v41 = vrot.slane %v359_v21, 7  ;;  %v475_v57 = vrot.slane %v359_v21, 1  ;;  %v457_v2 = vmul.f32 2.0, %v359_v21  ;;  %v596_v16 = vand.u32 2147483647, %v1289_v31 }
  0xc9   : > { %v450_v50 = vsel %vm387_vm1, %v1250_v58, %v434_v20  ;;  %v1316_v18 = vadd.f32 %v473_v8, %v462_v46  ;;  %v1330_v27 = vadd.f32 -0.5, %v232_v0  ;;  %vm1335_vm5 = vcmp.lt.f32.partialorder %v232_v0, 1.0 }
  0xca   : > { %v464_v13 = vadd.f32 %v456_v39, %v450_v50  ;;  %v436_v58 = vsel %vm387_vm1, %v434_v20, %v435_v41  ;;  %v476_v31 = vsel %vm362_vm0, %v474_v56, %v475_v57  ;;  %v237_v50 = vand.u32 2147483647, %v1103_v17 }
  0xcb   : > { %v1223_v28 = vpop.permute.xlu1 %302  ;;  %v559_v26 = vpop.permute.xlu2 %558  ;;  %v598_v41 = vand.u32 2147483647, %v1316_v18  ;;  %v234_v0 = vand.u32 2147483647, %v1066_v3 }
  0xcc   : > { %v1225_v29 = vpop.permute.xlu0 %300  ;;  %v581_v62 = vsel %vm312_vm3, %v559_v26, %v1137_v33  ;;  %v536_v33 = vsel %vm345_vm2, %v1165_v49, %v1231_v36  ;;  %v489_v26 = vsel %vm362_vm0, %v472_v35, %v1241_v45  ;;  %v253_v35 = vmul.f32 0.5, %v1103_v17 }
  0xcd   : > { %v319_v4 = vsel %vm312_vm3, %v1225_v29, %v1117_v23  ;;  %v589_v24 = vadd.f32 %v581_v62, %v549_v38  ;;  %v1324_v29 = vmul.f32 %v248_v42, %v1069_v5  ;;  %v1332_v20 = vadd.f32 %v489_v26, %v463_v52 }
  0xce   : > { %v465_v38 = vadd.f32 %v457_v2, %v436_v58  ;;  %v1339_v5 = vadd.f32 %v476_v31, %v464_v13  ;;  %v1341_v39 = vadd.f32 %v544_v6, %v536_v33  ;;  %v490_v42 = vsel %vm362_vm0, %v475_v57, %v359_v21 }
  0xcf   : > { %v605_v46 = vand.u32 2147483647, %v589_v24  ;;  %v320_v52 = vsel %vm312_vm3, %v1223_v28, %v1115_v22  ;;  %v599_v56 = vand.u32 2147483647, %v1332_v20  ;;  %v250_v2 = vmul.f32 0.5, %v1066_v3 }
  0xd0   : > { %v1358_v62 = vadd.f32 %v490_v42, %v465_v38  ;;  %v600_v21 = vand.u32 2147483647, %v1339_v5  ;;  %v1369_v8 = vmul.f32 %v253_v35, %v1103_v17  ;;  %v1374_v18 = vadd.f32 -0.5, %v237_v50 }
  0xd1   : > { %v251_v24 = vmul.f32 0.5, %v1081_v10  ;;  %vm1385_vm6 = vcmp.lt.f32.partialorder %v234_v0, 1.0  ;;  %vm1405_vm9 = vcmp.lt.f32.partialorder %v237_v50, 1.0 }
  0xd3   : > { %v509_v54 = vpop.permute.xlu1 %508  ;;  %v1321_v25 = vpop.permute.xlu2 %520 }
  0xd4   : > { %v1254_v61 = vpop.permute.xlu0 %335  ;;  %v532_v11 = vsel %vm345_vm2, %v1135_v32, %v509_v54  ;;  %v1328_v54 = vsub.f32 %v319_v4, %v352_v9 }
  0xd5   : > { %v548_v34 = vadd.f32 %v540_v15, %v532_v11  ;;  %v353_v28 = vsel %vm345_vm2, %v1115_v22, %v1254_v61  ;;  %v613_v11 = vadd.f32 %v605_v46, %v597_v51  ;;  %v235_v61 = vand.u32 2147483647, %v1081_v10 }
  0xd6   : > { %v437_v6 = vrot.slane %v1328_v54, 7  ;;  %v458_v13 = vmul.f32 2.0, %v1328_v54  ;;  %v1382_v17 = vsub.f32 %v320_v52, %v353_v28  ;;  %v259_v46 = vmul.f32 %v251_v24, %v1081_v10 }
  0xd7   : > { %v621_v38 = vmul.f32 0.0625, %v613_v11  ;;  %vm1401_vm8 = vcmp.lt.f32.partialorder %v235_v61, 1.0  ;;  %v252_v11 = vmul.f32 0.5, %v1093_v14 }
  0xd8   : > { %v459_v50 = vmul.f32 2.0, %v1382_v17 }
  0xd9   : > { %v629_v10 = vadd.f32 %v621_v38, %v273_v12  ;;  %v538_v12 = vsel %vm345_vm2, %v1191_v59, %v1321_v25 }
  0xdb   : > { %v515_v40 = vpop.permute.xlu1 %514  ;;  %v567_v51 = vpop.permute.xlu2 %566 }
  0xdc   : > { %v513_v43 = vpop.permute.xlu0 %512  ;;  %v535_v57 = vsel %vm345_vm2, %v1161_v47, %v515_v40  ;;  %v451_v40 = vsel %vm387_vm1, %v1328_v54, %v437_v6 }
  0xdd   : > { %v534_v58 = vsel %vm345_vm2, %v1163_v48, %v513_v43  ;;  %v258_v43 = vmul.f32 %v250_v2, %v1066_v3  ;;  %v585_v3 = vsel %vm312_vm3, %v567_v51, %v1177_v53 }
  0xde   : > { %v550_v20 = vadd.f32 %v1284_v30, %v534_v58  ;;  %v765_v30 = vadd.f32 -0.5, %v235_v61 }
  0xe3   : > { %v557_v37 = vpop.permute.xlu1 %556 }
  0xe4   : > { %v519_v45 = vpop.permute.xlu0 %518  ;;  %v580_v9 = vsel %vm312_vm3, %v557_v37, %v1135_v32  ;;  %v272_v32 = vsel %vm1335_vm5, %v1324_v29, %v1330_v27  ;;  %v551_v29 = vadd.f32 %v1287_v19, %v535_v57 }
  0xe5   : > { %v588_v15 = vadd.f32 %v580_v9, %v548_v34  ;;  %v537_v33 = vsel %vm345_vm2, %v1177_v53, %v519_v45  ;;  %v764_v34 = vadd.f32 -0.5, %v234_v0  ;;  %v601_v53 = vand.u32 2147483647, %v1358_v62 }
  0xe6   : > { %v553_v19 = vadd.f32 %v1301_v55, %v537_v33  ;;  %v466_v0 = vadd.f32 %v458_v13, %v451_v40  ;;  %v236_v62 = vand.u32 2147483647, %v1093_v14  ;;  %v478_v13 = vrot.slane %v1382_v17, 1 }
  0xe7   : > { %v604_v4 = vand.u32 2147483647, %v588_v15  ;;  %v438_v15 = vrot.slane %v1382_v17, 7  ;;  %v274_v2 = vsel %vm1385_vm6, %v258_v43, %v764_v34  ;;  %v547_v40 = vmul.f32 2.0, %v1203_v63 }
  0xe8   : > { %v766_v26 = vadd.f32 -0.5, %v236_v62  ;;  %vm1443_vm10 = vcmp.lt.f32.partialorder %v236_v62, 1.0 }
  0xe9   : > { %v612_v31 = vadd.f32 %v604_v4, %v596_v16  ;;  %v477_v16 = vrot.slane %v1328_v54, 1  ;;  %v593_v54 = vadd.f32 %v585_v3, %v553_v19  ;;  %v275_v4 = vsel %vm1401_vm8, %v259_v46, %v765_v30 }
  0xea   : > { %v439_v1 = vsel %vm387_vm1, %v437_v6, %v438_v15  ;;  %v644_v6 = vsel %vm636_vm7, %v629_v10, 0.0  ;;  %v255_v3 = vmul.f32 0.5, %v1115_v22  ;;  %v238_v46 = vand.u32 2147483647, %v1117_v23 }
  0xeb   : > { %v563_v27 = vpop.permute.xlu1 %562  ;;  %v620_v42 = vmul.f32 0.0625, %v612_v31  ;;  %v609_v61 = vand.u32 2147483647, %v593_v54  ;;  %v467_v43 = vadd.f32 %v459_v50, %v439_v1  ;;  %v554_v30 = vadd.f32 %v1295_v44, %v538_v12 }
  0xec   : > { %v561_v37 = vpop.permute.xlu0 %560  ;;  %v583_v36 = vsel %vm312_vm3, %v563_v27, %v1161_v47  ;;  %v260_v27 = vmul.f32 %v252_v11, %v1093_v14  ;;  %v491_v14 = vsel %vm362_vm0, %v478_v13, %v1382_v17  ;;  %v254_v17 = vmul.f32 0.5, %v1117_v23 }
  0xed   : > { %v582_v45 = vsel %vm312_vm3, %v561_v37, %v1163_v48  ;;  %v591_v9 = vadd.f32 %v583_v36, %v551_v29  ;;  %v617_v37 = vadd.f32 %v609_v61, %v601_v53  ;;  %v263_v10 = vmul.f32 %v255_v3, %v1115_v22 }
  0xee   : > { %v590_v35 = vadd.f32 %v582_v45, %v550_v20  ;;  %v499_v45 = vadd.f32 %v491_v14, %v467_v43  ;;  %v276_v53 = vsel %vm1443_vm10, %v260_v27, %v766_v26  ;;  %vm246_vm12 = vcmp.lt.f32.partialorder %v238_v46, 1.0 }
  0xef   : > { %v607_v55 = vand.u32 2147483647, %v591_v9  ;;  %v239_v9 = vand.u32 2147483647, %v1115_v22 }
  0xf0   : > { %v606_v52 = vand.u32 2147483647, %v590_v35  ;;  %v277_v35 = vsel %vm1405_vm9, %v1369_v8, %v1374_v18 }
  0xf1   : > { %v615_v28 = vadd.f32 %v607_v55, %v599_v56  ;;  %v628_v56 = vadd.f32 %v620_v42, %v272_v32  ;;  %v479_v32 = vsel %vm362_vm0, %v477_v16, %v478_v13  ;;  %v625_v42 = vmul.f32 0.0625, %v617_v37 }
  0xf2   : > { %v614_v57 = vadd.f32 %v606_v52, %v598_v41  ;;  %v498_v15 = vadd.f32 %v479_v32, %v466_v0  ;;  %v603_v52 = vand.u32 2147483647, %v499_v45  ;;  %v769_v54 = vadd.f32 -0.5, %v239_v9 }
  0xf3   : > { %v623_v7 = vmul.f32 0.0625, %v615_v28  ;;  %v565_v60 = vpop.permute.xlu1 %564  ;;  %v637_v31 = vsel %vm636_vm7, %v628_v56, 0.0  ;;  %vm247_vm11 = vcmp.lt.f32.partialorder %v239_v9, 1.0  ;;  %v262_v0 = vmul.f32 %v254_v17, %v1117_v23 }
  0xf4   : > { %v622_v58 = vmul.f32 0.0625, %v614_v57  ;;  %v523_v41 = vpop.permute.xlu0 %522  ;;  %v584_v33 = vsel %vm312_vm3, %v565_v60, %v1165_v49  ;;  %v633_v57 = vadd.f32 %v625_v42, %v277_v35  ;;  %v279_v13 = vsel %vm247_vm11, %v263_v10, %v769_v54 }
  0xf5   : > { %v631_v24 = vadd.f32 %v623_v7, %v275_v4  ;;  %v592_v29 = vadd.f32 %v584_v33, %v1341_v39  ;;  %v539_v49 = vsel %vm345_vm2, %v1203_v63, %v523_v41 }
  0xf6   : > { %v630_v51 = vadd.f32 %v622_v58, %v274_v2  ;;  %v555_v5 = vadd.f32 %v547_v40, %v539_v49  ;;  %v768_v2 = vadd.f32 -0.5, %v238_v46  ;;  %v647_v1 = vsel %vm636_vm7, %v633_v57, 0.0 }
  0xf7   : > { %v608_v25 = vand.u32 2147483647, %v592_v29  ;;  %v645_v20 = vsel %vm636_vm7, %v631_v24, 0.0 }
  0xf8   : > { %v638_v34 = vsel %vm636_vm7, %v630_v51, 0.0  ;;  %v646_v39 = vadd.f32 %v645_v20, %v644_v6  ;;  %v278_v7 = vsel %vm246_vm12, %v262_v0, %v768_v2 }
  0xf9   : > { %v616_v36 = vadd.f32 %v608_v25, %v600_v21  ;;  %v639_v38 = vadd.f32 %v638_v34, %v637_v31 }
  0xfa   : > { %v648_v56 = vadd.f32 %v647_v1, %v646_v39 }
  0xfb   : > { %v571_v21 = vpop.permute.xlu1 %570  ;;  %v624_v16 = vmul.f32 0.0625, %v616_v36 }
  0xfc   : > { %v569_v47 = vpop.permute.xlu0 %568  ;;  %v587_v55 = vsel %vm312_vm3, %v571_v21, %v1203_v63  ;;  %v602_v63 = vand.u32 2147483647, %v498_v15 }
  0xfd   : > { %v586_v8 = vsel %vm312_vm3, %v569_v47, %v1191_v59  ;;  %v595_v18 = vadd.f32 %v587_v55, %v555_v5  ;;  %v632_v28 = vadd.f32 %v624_v16, %v276_v53 }
  0xfe   : > { %v594_v48 = vadd.f32 %v586_v8, %v554_v30 }
  0xff   : > { %v611_v44 = vand.u32 2147483647, %v595_v18  ;;  %v640_v60 = vsel %vm636_vm7, %v632_v28, 0.0 }
 0x100   : > { %v610_v50 = vand.u32 2147483647, %v594_v48  ;;  %v641_v23 = vadd.f32 %v640_v60, %v639_v38 }
 0x101   : > { %v619_v4 = vadd.f32 %v611_v44, %v603_v52 }
 0x102   : > { %v618_v62 = vadd.f32 %v610_v50, %v602_v63 }
 0x103   : > { %v627_v59 = vmul.f32 0.0625, %v619_v4 }
 0x104   : > { %v626_v11 = vmul.f32 0.0625, %v618_v62 }
 0x105   : > { %v635_v22 = vadd.f32 %v627_v59, %v279_v13 }
 0x106   : > { %v634_v12 = vadd.f32 %v626_v11, %v278_v7 }
 0x107   : > { %v649_v58 = vsel %vm636_vm7, %v635_v22, 0.0 }
 0x108   : > { %v642_v41 = vsel %vm636_vm7, %v634_v12, 0.0  ;;  %v650_v33 = vadd.f32 %v649_v58, %v648_v56 }
 0x109   : > { %v643_v61 = vadd.f32 %v642_v41, %v641_v23 }
 0x10a   : > { %v652_v24 = vsel %vm636_vm7, %v650_v33, 0.0 }
 0x10b   : > { %v651_v40 = vsel %vm636_vm7, %v643_v61, 0.0 }
 0x10c   : > { %v653_v29 = vadd.f32 %v652_v24, %v651_v40 }
 0x10e   : > { %654 = vadd.xlane.f32.xlu2 %v653_v29 }
 0x181   : > { %v655_v51 = vpop.xlane.xlu2 %654 }
 0x182   : > { %v656_v26 = vrot.slane %v655_v51, 4 }
 0x184   : > { %v657_v43 = vadd.f32 %v656_v26, %v655_v51 }
 0x186   : > { %v658_v6 = vrot.slane %v657_v43, 2 }
 0x188   : > { %v659_v27 = vadd.f32 %v658_v6, %v657_v43 }
 0x18a   : > { %v660_v25 = vrot.slane %v659_v27, 1 }
 0x18c   : > { %v661_v32 = vadd.f32 %v660_v25, %v659_v27 }
 0x18e   : > { %776 = vpush %v661_v32 }
 0x1bf   : > { %s777_s25 = spop %776 }
 0x1c0   : > { %v663_v20 = vstv %s777_s25 }
 0x1c1   : > { %665 = vst.msk [vmem:[%s207_s24] sm:$0x1] %vm664_vm13, %v663_v20 }
 0x1c2 PF: > { %p15_p8 = scmp.ge.s32.totalorder %s967_s14, 4   ;;  %s1507_s9 = smov %s916_s10 }
 0x1c3   : > { %s1508_s10 = smov %s920_s11  ;;  %s1509_s11 = smov %s977_s17 }
 0x1c4   : > { %s1510_s12 = smov %s967_s14  ;;  %17 = sbr.rel (!%p15_p8) target bundleno = 5 (0x5), region = 81 }
 0x1c9   :  { %683 = vsyncpa [#allocation3], 1 }
 0x1ca   :  { %685 = vsyncpa [#allocation3 + $0x1], 1 }
 0x1cb   :  { %686 = vsyncpa [#allocation5], 1 }
 0x1cc   :  { %688 = vsyncpa [#allocation5 + $0x1], 1 }

</bundles_post_ra>
